<compile_context>
chip_gen: v7x
topology: tpu7x:2x2x1
jax: 0.10.0
libtpu: 0.0.40
codegen_flags: <defaults>
</compile_context>

<pallas_src>
import jax
import jax.numpy as jnp
from jax.experimental import pallas as pl
from jax.experimental.pallas import tpu as pltpu


def _round_up(x: int, m: int) -> int:
    return ((x + m - 1) // m) * m


def mlp_head_kernel(prem_ref, hypo_ref, w1p_ref, w1h_ref, b1_ref,
                    w2_ref, b2_ref, out_ref):
    # prem_ref/hypo_ref: (N_blk, E_pad) pooled embeddings (this grid step's tile).
    # concat([prem, hypo], -1) @ W1.T + b1 == prem @ W1p_t + hypo @ W1h_t + b1.
    h = (jnp.dot(prem_ref[...], w1p_ref[...], preferred_element_type=jnp.float32)
         + jnp.dot(hypo_ref[...], w1h_ref[...], preferred_element_type=jnp.float32)
         + b1_ref[...])                                    # (N_blk, H_pad)
    h = jnp.maximum(h, 0.0)                                # ReLU

    # layer_pred: (N_blk, H) @ (H, 1) as a VPU multiply + lane reduction
    # (avoids driving the MXU for a 1-column output).
    logits = jnp.sum(h * w2_ref[...], axis=-1, keepdims=True) + b2_ref[...]
    out_ref[...] = jax.nn.sigmoid(logits)                  # (N_blk, 1)


def shallow_nn_forward(premise, hypothesis, emb_table, W1, b1, W2, b2):
    """premise/hypothesis: int32 (N, L_p)/(N, L_h) token ids.
    emb_table: (V, E).  W1: (H, 2E), b1: (H,), W2: (1, H), b2: (1,)
    (PyTorch nn.Linear convention).  Returns (N,) float32 scores."""
    N = premise.shape[0]
    E = emb_table.shape[1]
    H = W1.shape[0]

    # --- XLA glue: embedding gather fused with the max-pool over L ---------
    # Only the (N, E) pooled tensors cross the Pallas boundary.
    prem = jnp.max(jnp.take(emb_table, premise, axis=0), axis=1)      # (N, E)
    hypo = jnp.max(jnp.take(emb_table, hypothesis, axis=0), axis=1)   # (N, E)

    # --- Padding for lane-dense tiles --------------------------------------
    e_pad = _round_up(E, 128)
    h_pad = _round_up(H, 128)
    n_blk = min(256, _round_up(N, 8))
    n_pad = _round_up(N, n_blk)

    f32 = jnp.float32
    prem_p = jnp.pad(prem.astype(f32), ((0, n_pad - N), (0, e_pad - E)))
    hypo_p = jnp.pad(hypo.astype(f32), ((0, n_pad - N), (0, e_pad - E)))
    # Zero-padded weight halves: padded lanes/rows contribute exactly 0.
    w1p = jnp.pad(W1[:, :E].T.astype(f32), ((0, e_pad - E), (0, h_pad - H)))
    w1h = jnp.pad(W1[:, E:].T.astype(f32), ((0, e_pad - E), (0, h_pad - H)))
    b1p = jnp.pad(b1.reshape(1, H).astype(f32), ((0, 0), (0, h_pad - H)))
    w2p = jnp.pad(W2.reshape(1, H).astype(f32), ((0, 0), (0, h_pad - H)))
    b2p = b2.reshape(1, 1).astype(f32)

    grid = (n_pad // n_blk,)

    # VMEM budget: double-buffered activation tiles + resident weights +
    # double-buffered output, with 2x headroom.  Stays inside every
    # generation's scoped default (16 MiB v5e / 32 MiB v6e,v7x).
    vmem_need = 4 * (2 * 2 * n_blk * e_pad      # prem + hypo tiles, 2 buffers
                     + 2 * e_pad * h_pad        # W1 halves (resident)
                     + 2 * h_pad + 1            # b1, w2 rows, b2
                     + 2 * n_blk)               # output tile, 2 buffers
    vmem_limit = int(min(max(2 * vmem_need, 4 << 20), 32 << 20))

    cost = pl.CostEstimate(
        flops=int(2 * 2 * n_pad * e_pad * h_pad + 4 * n_pad * h_pad),
        transcendentals=int(n_pad),
        bytes_accessed=int(4 * (2 * n_pad * e_pad + 2 * e_pad * h_pad
                                + 2 * h_pad + 1 + n_pad)),
    )

    out = pl.pallas_call(
        mlp_head_kernel,
        out_shape=jax.ShapeDtypeStruct((n_pad, 1), jnp.float32),
        grid_spec=pltpu.PrefetchScalarGridSpec(
            num_scalar_prefetch=0,
            grid=grid,
            in_specs=[
                # Batch-tiled pooled activations (pipelined over the N grid).
                pl.BlockSpec((n_blk, e_pad), lambda i: (i, 0)),
                pl.BlockSpec((n_blk, e_pad), lambda i: (i, 0)),
                # Parameters: constant block index -> stay resident in VMEM.
                pl.BlockSpec((e_pad, h_pad), lambda i: (0, 0)),
                pl.BlockSpec((e_pad, h_pad), lambda i: (0, 0)),
                pl.BlockSpec((1, h_pad), lambda i: (0, 0)),
                pl.BlockSpec((1, h_pad), lambda i: (0, 0)),
                pl.BlockSpec((1, 1), lambda i: (0, 0)),
            ],
            out_specs=pl.BlockSpec((n_blk, 1), lambda i: (i, 0)),
        ),
        compiler_params=pltpu.CompilerParams(
            dimension_semantics=("parallel",),
            vmem_limit_bytes=vmem_limit,
        ),
        cost_estimate=cost,
    )(prem_p, hypo_p, w1p, w1h, b1p, w2p, b2p)

    return out[:N, 0]            # torch.squeeze -> (N,)


def reference_forward(premise, hypothesis, emb_table, W1, b1, W2, b2):
    prem = jnp.max(jnp.take(emb_table, premise, axis=0), axis=1)
    hypo = jnp.max(jnp.take(emb_table, hypothesis, axis=0), axis=1)
    concat = jnp.concatenate([prem, hypo], axis=1)
    h = jnp.maximum(concat @ W1.T + b1, 0.0)
    logits = h @ W2.T + b2
    return jax.nn.sigmoid(logits)[:, 0]


if __name__ == "__main__":
    # Small, deterministic synthetic setup consistent with the module.
    N, L_p, L_h = 2, 8, 10
    V, E, H = 32, 16, 32

    key = jax.random.PRNGKey(0)
    k_emb, k_w1, k_b1, k_w2, k_b2, k_p, k_h = jax.random.split(key, 7)

    emb_table = jax.random.normal(k_emb, (V, E), dtype=jnp.float32)
    bound1 = 1.0 / (2 * E) ** 0.5
    W1 = jax.random.uniform(k_w1, (H, 2 * E), minval=-bound1, maxval=bound1,
                            dtype=jnp.float32)
    b1 = jax.random.uniform(k_b1, (H,), minval=-bound1, maxval=bound1,
                            dtype=jnp.float32)
    bound2 = 1.0 / H ** 0.5
    W2 = jax.random.uniform(k_w2, (1, H), minval=-bound2, maxval=bound2,
                            dtype=jnp.float32)
    b2 = jax.random.uniform(k_b2, (1,), minval=-bound2, maxval=bound2,
                            dtype=jnp.float32)

    premise = jax.random.randint(k_p, (N, L_p), 0, V, dtype=jnp.int32)
    hypothesis = jax.random.randint(k_h, (N, L_h), 0, V, dtype=jnp.int32)

    out = shallow_nn_forward(premise, hypothesis, emb_table, W1, b1, W2, b2)
    out = jax.block_until_ready(out)

    ref = reference_forward(premise, hypothesis, emb_table, W1, b1, W2, b2)
    assert out.shape == (N,), out.shape
    assert jnp.allclose(out, ref, atol=1e-5, rtol=1e-5), (out, ref)

    print("KERNEL_OK")
</pallas_src>

<mosaic_0001>
module attributes {stable_mosaic.version = 11 : i64} {
  func.func @mlp_head_kernel(%arg0: i32, %arg1: memref<8x128xf32, #tpu.memory_space<vmem>>, %arg2: memref<8x128xf32, #tpu.memory_space<vmem>>, %arg3: memref<128x128xf32, #tpu.memory_space<vmem>>, %arg4: memref<128x128xf32, #tpu.memory_space<vmem>>, %arg5: memref<1x128xf32, #tpu.memory_space<vmem>>, %arg6: memref<1x128xf32, #tpu.memory_space<vmem>>, %arg7: memref<1x1xf32, #tpu.memory_space<vmem>>, %arg8: memref<8x1xf32, #tpu.memory_space<vmem>>) attributes {dimension_semantics = [#tpu.dimension_semantics<parallel>], iteration_bounds = array<i64: 1>, scalar_prefetch = 0 : i64, scratch_operands = 0 : i64, tpu.core_type = #tpu.core_type<tc>, window_params = [{transform_indices = @transform_0, window_bounds = array<i64: 8, 128>}, {transform_indices = @transform_1, window_bounds = array<i64: 8, 128>}, {pipeline_mode = #tpu.pipeline_mode<synchronous>, transform_indices = @transform_2, window_bounds = array<i64: 128, 128>}, {pipeline_mode = #tpu.pipeline_mode<synchronous>, transform_indices = @transform_3, window_bounds = array<i64: 128, 128>}, {pipeline_mode = #tpu.pipeline_mode<synchronous>, transform_indices = @transform_4, window_bounds = array<i64: 1, 128>}, {pipeline_mode = #tpu.pipeline_mode<synchronous>, transform_indices = @transform_5, window_bounds = array<i64: 1, 128>}, {pipeline_mode = #tpu.pipeline_mode<synchronous>, transform_indices = @transform_6, window_bounds = array<i64: 1, 1>}, {transform_indices = @transform_7, window_bounds = array<i64: 8, 1>}]} {
    %c0 = arith.constant 0 : index
    %c0_0 = arith.constant 0 : index
    %0 = vector.load %arg1[%c0, %c0_0] : memref<8x128xf32, #tpu.memory_space<vmem>>, vector<8x128xf32>
    %c0_1 = arith.constant 0 : index
    %c0_2 = arith.constant 0 : index
    %1 = vector.load %arg3[%c0_1, %c0_2] : memref<128x128xf32, #tpu.memory_space<vmem>>, vector<128x128xf32>
    %cst = arith.constant dense<0.000000e+00> : vector<8x128xf32>
    %2 = tpu.matmul %0, %1, %cst {dimension_numbers = #tpu.dot_dimension_numbers<[1], [0], [0], [1], [0, 0, 1, 1], [], []>} : vector<8x128xf32>, vector<128x128xf32>, vector<8x128xf32> -> vector<8x128xf32>
    %c0_3 = arith.constant 0 : index
    %c0_4 = arith.constant 0 : index
    %3 = vector.load %arg2[%c0_3, %c0_4] : memref<8x128xf32, #tpu.memory_space<vmem>>, vector<8x128xf32>
    %c0_5 = arith.constant 0 : index
    %c0_6 = arith.constant 0 : index
    %4 = vector.load %arg4[%c0_5, %c0_6] : memref<128x128xf32, #tpu.memory_space<vmem>>, vector<128x128xf32>
    %cst_7 = arith.constant dense<0.000000e+00> : vector<8x128xf32>
    %5 = tpu.matmul %3, %4, %cst_7 {dimension_numbers = #tpu.dot_dimension_numbers<[1], [0], [0], [1], [0, 0, 1, 1], [], []>} : vector<8x128xf32>, vector<128x128xf32>, vector<8x128xf32> -> vector<8x128xf32>
    %6 = arith.addf %2, %5 : vector<8x128xf32>
    %c0_8 = arith.constant 0 : index
    %c0_9 = arith.constant 0 : index
    %7 = vector.load %arg5[%c0_8, %c0_9] : memref<1x128xf32, #tpu.memory_space<vmem>>, vector<1x128xf32>
    %8 = vector.broadcast %7 : vector<1x128xf32> to vector<8x128xf32>
    %9 = arith.addf %6, %8 : vector<8x128xf32>
    %cst_10 = arith.constant 0.000000e+00 : f32
    %10 = vector.broadcast %cst_10 : f32 to vector<8x128xf32>
    %11 = arith.maximumf %9, %10 : vector<8x128xf32>
    %c0_11 = arith.constant 0 : index
    %c0_12 = arith.constant 0 : index
    %12 = vector.load %arg6[%c0_11, %c0_12] : memref<1x128xf32, #tpu.memory_space<vmem>>, vector<1x128xf32>
    %13 = vector.broadcast %12 : vector<1x128xf32> to vector<8x128xf32>
    %14 = arith.mulf %11, %13 : vector<8x128xf32>
    %cst_13 = arith.constant dense<0.000000e+00> : vector<8xf32>
    %15 = vector.multi_reduction <add>, %14, %cst_13 [1] : vector<8x128xf32> to vector<8xf32>
    %16 = vector.shape_cast %15 : vector<8xf32> to vector<8x1xf32>
    %c0_14 = arith.constant 0 : index
    %c0_15 = arith.constant 0 : index
    %17 = vector.load %arg7[%c0_14, %c0_15] : memref<1x1xf32, #tpu.memory_space<vmem>>, vector<1x1xf32>
    %18 = vector.broadcast %17 : vector<1x1xf32> to vector<8x1xf32>
    %19 = arith.addf %16, %18 : vector<8x1xf32>
    %20 = arith.negf %19 : vector<8x1xf32>
    %21 = math.exp %20 : vector<8x1xf32>
    %cst_16 = arith.constant 1.000000e+00 : f32
    %22 = vector.broadcast %cst_16 : f32 to vector<8x1xf32>
    %23 = arith.addf %22, %21 : vector<8x1xf32>
    %24 = arith.divf %22, %23 : vector<8x1xf32>
    %c0_17 = arith.constant 0 : index
    %c0_18 = arith.constant 0 : index
    %25 = vector.load %arg8[%c0_17, %c0_18] : memref<8x1xf32, #tpu.memory_space<vmem>>, vector<8x1xf32>
    tpu.vector_store %arg8[%c0_17, %c0_18], %24 {strides = array<i32>} : memref<8x1xf32, #tpu.memory_space<vmem>>, vector<8x1xf32>,
    return
  }
  func.func @transform_0(%arg0: i32) -> (i32, i32) {
    %c0_i32 = arith.constant 0 : i32
    %c0_i32_0 = arith.constant 0 : i32
    return %arg0, %c0_i32 : i32, i32
  }
  func.func @transform_1(%arg0: i32) -> (i32, i32) {
    %c0_i32 = arith.constant 0 : i32
    %c0_i32_0 = arith.constant 0 : i32
    return %arg0, %c0_i32 : i32, i32
  }
  func.func @transform_2(%arg0: i32) -> (i32, i32) {
    %c0_i32 = arith.constant 0 : i32
    %c0_i32_0 = arith.constant 0 : i32
    %c0_i32_1 = arith.constant 0 : i32
    return %c0_i32, %c0_i32_0 : i32, i32
  }
  func.func @transform_3(%arg0: i32) -> (i32, i32) {
    %c0_i32 = arith.constant 0 : i32
    %c0_i32_0 = arith.constant 0 : i32
    %c0_i32_1 = arith.constant 0 : i32
    return %c0_i32, %c0_i32_0 : i32, i32
  }
  func.func @transform_4(%arg0: i32) -> (i32, i32) {
    %c0_i32 = arith.constant 0 : i32
    %c0_i32_0 = arith.constant 0 : i32
    %c0_i32_1 = arith.constant 0 : i32
    return %c0_i32, %c0_i32_0 : i32, i32
  }
  func.func @transform_5(%arg0: i32) -> (i32, i32) {
    %c0_i32 = arith.constant 0 : i32
    %c0_i32_0 = arith.constant 0 : i32
    %c0_i32_1 = arith.constant 0 : i32
    return %c0_i32, %c0_i32_0 : i32, i32
  }
  func.func @transform_6(%arg0: i32) -> (i32, i32) {
    %c0_i32 = arith.constant 0 : i32
    %c0_i32_0 = arith.constant 0 : i32
    %c0_i32_1 = arith.constant 0 : i32
    return %c0_i32, %c0_i32_0 : i32, i32
  }
  func.func @transform_7(%arg0: i32) -> (i32, i32) {
    %c0_i32 = arith.constant 0 : i32
    %c0_i32_0 = arith.constant 0 : i32
    return %arg0, %c0_i32 : i32, i32
  }
}

</mosaic_0001>

<bundles_post_ra>
// kernel: tpu_custom_call.1
= control target key start
LH: loop header
LB: loop body
LE: loop exit
PB: predicated region body
PF: predicated region fallthrough
CT: control target
= control target key end

     0   :  { %s683_s0 = inlined_call_operand.hbm [shape: f32[8,128], index: 0, kind: input, shape index: {}]   ;;  %s684_s1 = inlined_call_operand.hbm [shape: f32[8,128], index: 1, kind: input, shape index: {}]   ;;  %s685_s2 = inlined_call_operand.hbm [shape: f32[128,128], index: 2, kind: input, shape index: {}]   ;;  %s686_s3 = inlined_call_operand.hbm [shape: f32[128,128], index: 3, kind: input, shape index: {}]   ;;  %s687_s4 = inlined_call_operand.vmem [shape: f32[1,128], index: 4, kind: input, shape index: {}]   ;;  %s688_s5 = inlined_call_operand.vmem [shape: f32[1,128], index: 5, kind: input, shape index: {}]   ;;  %s689_s6 = inlined_call_operand.<no memory space> [shape: f32[1,1], index: 6, kind: input, shape index: {}]   ;;  %s690_s7 = inlined_call_operand.vmem [shape: f32[8,1], index: 7, kind: output, shape index: {}]  }
   0x1   :  { %v12_v0 = vstv %s689_s6 }
   0x2   :  { %13 = vst [vmem:[#allocation2] sm:$0x1] %v12_v0 }
   0x3   :  { %14 = vsyncpa [#allocation4], 0 }
   0x4   :  { %15 = vsyncpa [#allocation6], 0 }
   0x5   :  { %16 = vsyncpa [#allocation9], 0  ;;  %s558_s26 = smov [#allocation5]   ;;  %s559_s28 = smov [#allocation3]  }
   0x6   :  { %s33_s27 = sshll.u32 %s558_s26, 4  ;;  %s23_s29 = sshll.u32 %s559_s28, 4  ;;  %s34_s27 = int_to_ptr.vmem [resolvable:$true] %s33_s27  ;;  %s24_s29 = int_to_ptr.vmem [resolvable:$true] %s23_s29 }
   0x7   :  { %s464_s9 = scalar_lea.hbm %s684_s1, 128 }
   0x8   :  { %p465_p0 = scmp.ne.s32.totalorder %s684_s1, %s464_s9  ;;  %p468_p1 = scmp.lt.u32.totalorder %s464_s9, %s684_s1 }
   0xa   :  { %p470_p2 = pnand %p468_p1, %p465_p0 }
   0xc   :  { %473 = shalt.err (!%p470_p2)
}
   0xd   :  { %s474_s13 = scalar_lea.vmem %s34_s27, 128  ;;  %p479_p4 = scmp.lt.s32.totalorder %s34_s27, %s34_s27 }
   0xe   :  { %p475_p3 = scmp.ne.s32.totalorder %s34_s27, %s474_s13  ;;  %p480_p5 = scmp.lt.s32.totalorder %s474_s13, %s474_s13 }
  0x10   :  { %p481_p6 = por %p480_p5, %p479_p4 }
  0x12   :  { %p482_p7 = pnand %p481_p6, %p475_p3 }
  0x14   :  { %485 = shalt.err (!%p482_p7)
}
  0x15   :  { %36 = dma.hbm_to_vmem [thread:$0]  %s684_s1, 128, %s34_s27, [#allocation6]  }
  0x16   :  { %s486_s18 = scalar_lea.hbm %s683_s0, 128 }
  0x17   :  { %p487_p8 = scmp.ne.s32.totalorder %s683_s0, %s486_s18  ;;  %p490_p9 = scmp.lt.u32.totalorder %s486_s18, %s683_s0 }
  0x19   :  { %p492_p10 = pnand %p490_p9, %p487_p8 }
  0x1b   :  { %495 = shalt.err (!%p492_p10)
}
  0x1c   :  { %s496_s23 = scalar_lea.vmem %s24_s29, 128  ;;  %p501_p12 = scmp.lt.s32.totalorder %s24_s29, %s24_s29 }
  0x1d   :  { %p497_p11 = scmp.ne.s32.totalorder %s24_s29, %s496_s23  ;;  %p502_p13 = scmp.lt.s32.totalorder %s496_s23, %s496_s23 }
  0x1f   :  { %p503_p0 = por %p502_p13, %p501_p12 }
  0x21   :  { %p504_p1 = pnand %p503_p0, %p497_p11 }
  0x23   :  { %507 = shalt.err (!%p504_p1)
}
  0x24   :  { %26 = dma.hbm_to_vmem [thread:$0]  %s683_s0, 128, %s24_s29, [#allocation4]  }
  0x25   :  { %s560_s25 = smov [#allocation7]   ;;  %s508_s30 = scalar_lea.hbm %s685_s2, 2048 }
  0x26   :  { %s42_s26 = sshll.u32 %s560_s25, 4  ;;  %p509_p2 = scmp.ne.s32.totalorder %s685_s2, %s508_s30  ;;  %s43_s26 = int_to_ptr.vmem [resolvable:$true] %s42_s26 }
  0x27   :  { %p512_p3 = scmp.lt.u32.totalorder %s508_s30, %s685_s2 }
  0x29   :  { %p514_p4 = pnand %p512_p3, %p509_p2 }
  0x2b   :  { %517 = shalt.err (!%p514_p4)
}
  0x2c   :  { %s518_s12 = scalar_lea.vmem %s43_s26, 2048  ;;  %p523_p6 = scmp.lt.s32.totalorder %s43_s26, %s43_s26 }
  0x2d   :  { %p519_p5 = scmp.ne.s32.totalorder %s43_s26, %s518_s12  ;;  %p524_p7 = scmp.lt.s32.totalorder %s518_s12, %s518_s12 }
  0x2f   :  { %p525_p8 = por %p524_p7, %p523_p6 }
  0x31   :  { %p526_p9 = pnand %p525_p8, %p519_p5 }
  0x33   :  { %529 = shalt.err (!%p526_p9)
}
  0x34   :  { %s561_s0 = smov 128   ;;  %s562_s29 = smov 8  }
  0x35   :  { %48 = dma.hbm_to_vmem [thread:$0]  %s685_s2, 2048, %s43_s26, [#allocation6], %s561_s0, %s561_s0, %s562_s29  }
  0x36   :  { %s563_s14 = smov [#allocation8]   ;;  %s530_s18 = scalar_lea.hbm %s686_s3, 2048 }
  0x37   :  { %s54_s15 = sshll.u32 %s563_s14, 4  ;;  %p531_p10 = scmp.ne.s32.totalorder %s686_s3, %s530_s18  ;;  %s55_s15 = int_to_ptr.vmem [resolvable:$true] %s54_s15 }
  0x38   :  { %p534_p11 = scmp.lt.u32.totalorder %s530_s18, %s686_s3 }
  0x3a   :  { %p536_p12 = pnand %p534_p11, %p531_p10 }
  0x3c   :  { %539 = shalt.err (!%p536_p12)
}
  0x3d   :  { %s540_s23 = scalar_lea.vmem %s55_s15, 2048  ;;  %p545_p0 = scmp.lt.s32.totalorder %s55_s15, %s55_s15 }
  0x3e   :  { %p541_p13 = scmp.ne.s32.totalorder %s55_s15, %s540_s23  ;;  %p546_p1 = scmp.lt.s32.totalorder %s540_s23, %s540_s23 }
  0x40   :  { %p547_p2 = por %p546_p1, %p545_p0 }
  0x42   :  { %p548_p3 = pnand %p547_p2, %p541_p13 }
  0x44   :  { %551 = shalt.err (!%p548_p3)
}
  0x45   :  { %60 = dma.hbm_to_vmem [thread:$0]  %s686_s3, 2048, %s55_s15, [#allocation9], %s561_s0, %s561_s0, %s562_s29  }
  0x46   :  { %552 = dma.done.wait [#allocation4], 128  }
  0x47   :  { %553 = vsyncadd [#allocation4], 4294967168 }
  0x48   :  { %554 = dma.done.wait [#allocation6], 2176  }
  0x49   :  { %555 = vsyncadd [#allocation6], 4294965120 }
  0x4a   :  { %556 = dma.done.wait [#allocation9], 2048  }
  0x4b   :  { %557 = vsyncadd [#allocation9], 4294965248  ;;  %v564_v1 = vmov 0.0|0.0   ;;  %vm565_vm0 = vmmov 0   ;;  %v566_v2 = vmov 0.0   ;;  %v97_v3 = vld [vmem:[#allocation8] sm:$0xff] }
  0x4c   :  { %403 = vmatprep.subr.bf16.mxu0 %v564_v1  ;;  %427 = vmatprep.subr.bf16.mxu1 %v564_v1  ;;  %v98_v4 = vld [vmem:[#allocation8 + $0x8] sm:$0xff]  ;;  %v80_v5 = vld [vmem:[#allocation7] sm:$0xff]  ;;  %v99_v8 = vld [vmem:[#allocation8 + $0x10] sm:$0xff]  ;;  %vm286_vm1 = vcmask 7168  }
  0x4d   :  { %365 = vmatprep.mubr.msk.f32.mxu0 %vm565_vm0, %v566_v2  ;;  %400 = vmatprep.mubr.msk.f32.mxu1 %vm565_vm0, %v566_v2  ;;  %v404_v6 = vpack.c.bf16 %v98_v4, %v97_v3  ;;  %v81_v7 = vld [vmem:[#allocation7 + $0x8] sm:$0xff]  ;;  %v100_v9 = vld [vmem:[#allocation8 + $0x18] sm:$0xff]  ;;  %v82_v11 = vld [vmem:[#allocation7 + $0x10] sm:$0xff] }
  0x4e   :  { %v428_v10 = vpack.c.bf16 %v81_v7, %v80_v5  ;;  %v83_v12 = vld [vmem:[#allocation7 + $0x18] sm:$0xff]  ;;  %v407_v13 = vpack.c.bf16 %v100_v9, %v99_v8  ;;  %v101_v15 = vld [vmem:[#allocation8 + $0x20] sm:$0xff]  ;;  %v102_v16 = vld [vmem:[#allocation8 + $0x28] sm:$0xff] }
  0x4f   :  { %405 = vmatpush3.bf16.msra.mxu0 %v404_v6  ;;  %v431_v14 = vpack.c.bf16 %v83_v12, %v82_v11  ;;  %v84_v17 = vld [vmem:[#allocation7 + $0x20] sm:$0xff]  ;;  %v85_v18 = vld [vmem:[#allocation7 + $0x28] sm:$0xff]  ;;  %v410_v19 = vpack.c.bf16 %v102_v16, %v101_v15  ;;  %v103_v21 = vld [vmem:[#allocation8 + $0x30] sm:$0xff] }
  0x50   :  { %429 = vmatpush3.bf16.msra.mxu1 %v428_v10  ;;  %406 = vmatprep.subr.bf16.mxu0 %v564_v1  ;;  %v434_v20 = vpack.c.bf16 %v85_v18, %v84_v17  ;;  %v104_v22 = vld [vmem:[#allocation8 + $0x38] sm:$0xff]  ;;  %v86_v23 = vld [vmem:[#allocation7 + $0x30] sm:$0xff]  ;;  %v105_v27 = vld [vmem:[#allocation8 + $0x40] sm:$0xff] }
  0x51   :  { %430 = vmatprep.subr.bf16.mxu1 %v564_v1  ;;  %v87_v24 = vld [vmem:[#allocation7 + $0x38] sm:$0xff]  ;;  %v413_v25 = vpack.c.bf16 %v104_v22, %v103_v21  ;;  %v106_v28 = vld [vmem:[#allocation8 + $0x48] sm:$0xff]  ;;  %v88_v29 = vld [vmem:[#allocation7 + $0x40] sm:$0xff] }
  0x52   :  { %v437_v26 = vpack.c.bf16 %v87_v24, %v86_v23  ;;  %v89_v30 = vld [vmem:[#allocation7 + $0x48] sm:$0xff]  ;;  %v416_v31 = vpack.c.bf16 %v106_v28, %v105_v27  ;;  %v107_v33 = vld [vmem:[#allocation8 + $0x50] sm:$0xff]  ;;  %v108_v34 = vld [vmem:[#allocation8 + $0x58] sm:$0xff] }
  0x53   :  { %408 = vmatpush3.bf16.msra.mxu0 %v407_v13  ;;  %v440_v32 = vpack.c.bf16 %v89_v30, %v88_v29  ;;  %v90_v35 = vld [vmem:[#allocation7 + $0x50] sm:$0xff]  ;;  %v91_v36 = vld [vmem:[#allocation7 + $0x58] sm:$0xff]  ;;  %v419_v37 = vpack.c.bf16 %v108_v34, %v107_v33  ;;  %v109_v39 = vld [vmem:[#allocation8 + $0x60] sm:$0xff] }
  0x54   :  { %432 = vmatpush3.bf16.msra.mxu1 %v431_v14  ;;  %409 = vmatprep.subr.bf16.mxu0 %v564_v1  ;;  %v443_v38 = vpack.c.bf16 %v91_v36, %v90_v35  ;;  %v110_v40 = vld [vmem:[#allocation8 + $0x68] sm:$0xff]  ;;  %v92_v41 = vld [vmem:[#allocation7 + $0x60] sm:$0xff]  ;;  %v111_v45 = vld [vmem:[#allocation8 + $0x70] sm:$0xff] }
  0x55   :  { %433 = vmatprep.subr.bf16.mxu1 %v564_v1  ;;  %v93_v42 = vld [vmem:[#allocation7 + $0x68] sm:$0xff]  ;;  %v422_v43 = vpack.c.bf16 %v110_v40, %v109_v39  ;;  %v112_v46 = vld [vmem:[#allocation8 + $0x78] sm:$0xff]  ;;  %v94_v47 = vld [vmem:[#allocation7 + $0x70] sm:$0xff] }
  0x56   :  { %v446_v44 = vpack.c.bf16 %v93_v42, %v92_v41  ;;  %v95_v48 = vld [vmem:[#allocation7 + $0x78] sm:$0xff]  ;;  %v425_v49 = vpack.c.bf16 %v112_v46, %v111_v45  ;;  %v79_v52 = vld [vmem:[#allocation3] sm:$0xff]  ;;  %v295_v56 = vld [vmem:[%s687_s4] ss:$0 sm:$0xff] }
  0x57   :  { %411 = vmatpush3.bf16.msra.mxu0 %v410_v19  ;;  %v449_v50 = vpack.c.bf16 %v95_v48, %v94_v47  ;;  %v96_v51 = vld [vmem:[#allocation5] sm:$0xff]  ;;  %v296_v60 = vld [vmem:[%s688_s5] ss:$0 sm:$0xff] }
  0x58   :  { %435 = vmatpush3.bf16.msra.mxu1 %v434_v20  ;;  %412 = vmatprep.subr.bf16.mxu0 %v564_v1  ;;  %v297_v63 = vld [vmem:[#allocation2] ss:$0 sm:$0xff] }
  0x59   :  { %436 = vmatprep.subr.bf16.mxu1 %v564_v1 }
  0x5b   :  { %414 = vmatpush3.bf16.msra.mxu0 %v413_v25 }
  0x5c   :  { %438 = vmatpush3.bf16.msra.mxu1 %v437_v26  ;;  %415 = vmatprep.subr.bf16.mxu0 %v564_v1 }
  0x5d   :  { %439 = vmatprep.subr.bf16.mxu1 %v564_v1 }
  0x5f   :  { %417 = vmatpush3.bf16.msra.mxu0 %v416_v31 }
  0x60   :  { %441 = vmatpush3.bf16.msra.mxu1 %v440_v32  ;;  %418 = vmatprep.subr.bf16.mxu0 %v564_v1 }
  0x61   :  { %442 = vmatprep.subr.bf16.mxu1 %v564_v1 }
  0x63   :  { %420 = vmatpush3.bf16.msra.mxu0 %v419_v37 }
  0x64   :  { %444 = vmatpush3.bf16.msra.mxu1 %v443_v38  ;;  %421 = vmatprep.subr.bf16.mxu0 %v564_v1 }
  0x65   :  { %445 = vmatprep.subr.bf16.mxu1 %v564_v1 }
  0x67   :  { %423 = vmatpush3.bf16.msra.mxu0 %v422_v43 }
  0x68   :  { %447 = vmatpush3.bf16.msra.mxu1 %v446_v44  ;;  %424 = vmatprep.subr.bf16.mxu0 %v564_v1 }
  0x69   :  { %448 = vmatprep.subr.bf16.mxu1 %v564_v1 }
  0x6b   :  { %426 = vmatpush3.bf16.msra.mxu0 %v425_v49 }
  0x6c   :  { %450 = vmatpush3.bf16.msra.mxu1 %v449_v50 }
  0x6e   :  { %366 = vmatmul.mubr.f32.vlgmr.msra.gmra.mrb[0].mxu0 %v96_v51 }
  0x6f   :  { %401 = vmatmul.mubr.f32.vlgmr.msra.gmra.mrb[0].mxu1 %v79_v52 }
 0x141   :  { %v179_v53 = vpop.f32.mrb[0].mxu0 }
 0x142   :  { %v249_v54 = vpop.f32.mrb[0].mxu1  ;;  %v367_v55 = vpop.f32.mrb[1].mxu0 }
 0x143   :  { %v250_v57 = vadd.f32 %v249_v54, %v179_v53  ;;  %v402_v58 = vpop.f32.mrb[1].mxu1 }
 0x145   :  { %v260_v59 = vadd.f32 %v295_v56, %v250_v57 }
 0x147   :  { %v261_v61 = vmax.f32 %v260_v59, 0.0 }
 0x149   :  { %v269_v62 = vmul.f32 %v296_v60, %v261_v61 }
 0x14b   :  { %270 = vadd.xlane.f32.xlu0 %v269_v62 }
 0x1d8   :  { %v271_v0 = vpop.xlane.xlu0 %270 }
 0x1d9   :  { %v279_v1 = vadd.f32 %v297_v63, %v271_v0 }
 0x1db   :  { %v298_v2 = vmul.f32 -1.442695, %v279_v1 }
 0x1dd   :  { %460 = vpow2.f32 %v298_v2 }
 0x1e7   :  { %v461_v3 = vpop.eup %460 }
 0x1e8   :  { %v283_v4 = vadd.f32 1.0, %v461_v3 }
 0x1ea   :  { %462 = vrcp.f32 %v283_v4 }
 0x1f4   :  { %v463_v5 = vpop.eup %462 }
 0x1f5   :  { %287 = vst.msk [vmem:[%s690_s7] sm:$0xff] %vm286_vm1, %v463_v5 }
 0x1f6   :  { %292 = vsyncpa [#allocation4], 1 }
 0x1f7   :  { %293 = vsyncpa [#allocation6], 1 }
 0x1f8   :  { %294 = vsyncpa [#allocation9], 1 }

</bundles_post_ra>
